<compile_context>
chip_gen: v6e
topology: v6e:2x2x1
jax: 0.10.0
libtpu: 0.0.40
codegen_flags: <defaults>
</compile_context>

<pallas_src>
import jax
import jax.numpy as jnp
from jax import lax
from jax.experimental import pallas as pl
from jax.experimental.pallas import tpu as pltpu

NEG_SLOPE = 0.01   # F.leaky_relu default
CHUNK = 256        # in-kernel lane-chunk (batch rows per inner step); multiple of 128


def _leaky_relu(x):
    # max(x, a*x) == leaky_relu(x) for 0 < a < 1; cheaper than cmp+mul+select.
    return jnp.maximum(x, NEG_SLOPE * x)


def _round_up(n, m):
    return ((n + m - 1) // m) * m


def _cdiv(a, b):
    return -(-a // b)


def critic_kernel(x_ref, w1_ref, b1_ref, w2_ref, b2_ref, w3_ref, b3_ref, out_ref):
    # Transposed dataflow: batch lives on the 128-lane axis for every intermediate.
    w1 = w1_ref[...]   # (64, S)
    b1 = b1_ref[...]   # (64, 1)
    w2 = w2_ref[...]   # (8, 64)
    b2 = b2_ref[...]   # (8, 1)
    w3 = w3_ref[...]   # (1, 8)
    b3 = b3_ref[...]   # (1, 1)

    tb = x_ref.shape[0]          # static block size (multiple of 128)

    def compute_chunk(start, size):
        xc = x_ref[pl.ds(start, size), :]                                  # (size, S)
        # h1^T = W1 @ xc^T : contract the feature axis of both operands.
        h1 = lax.dot_general(
            w1, xc,
            dimension_numbers=(((1,), (1,)), ((), ())),
            preferred_element_type=jnp.float32)                            # (64, size)
        h1 = _leaky_relu(h1 + b1)
        h2 = _leaky_relu(
            jnp.dot(w2, h1, preferred_element_type=jnp.float32) + b2)      # (8, size)
        v = jnp.dot(w3, h2, preferred_element_type=jnp.float32) + b3       # (1, size)
        out_ref[:, pl.ds(start, size)] = v                                 # lane-dense store

    n_full = tb // CHUNK
    rem = tb - n_full * CHUNK

    if n_full > 0:
        def body(c, carry):
            start = pl.multiple_of(c * CHUNK, CHUNK)
            compute_chunk(start, CHUNK)
            return carry
        lax.fori_loop(0, n_full, body, 0)

    if rem > 0:                      # static remainder (tb is a multiple of 128)
        compute_chunk(n_full * CHUNK, rem)


def _choose_tiling(B, tb_max):
    """Pick (TB, num_tiles, B_pad): TB multiple of 128, >=2 tiles when B>=256 (v7x
    dual-TC), and prefer a tile count that divides the 128-aligned batch exactly so
    padding beyond 128-alignment (an extra HBM pass over x) is avoided."""
    B128 = _round_up(B, 128)
    nblk = B128 // 128
    max_bpt = max(1, tb_max // 128)
    min_tiles = 2 if nblk >= 2 else 1
    lo = max(min_tiles, _cdiv(nblk, max_bpt))
    num_tiles = lo
    for t in range(lo, min(nblk, lo + 8) + 1):
        if nblk % t == 0:            # exact split -> no padding beyond 128-alignment
            num_tiles = t
            break
    bpt = _cdiv(nblk, num_tiles)
    TB = bpt * 128
    return TB, num_tiles, TB * num_tiles


def critic_forward(x, params, *, tb_max=4096):
    """x: (B, num_state) float32.  params in PyTorch orientation:
    w: (out_features, in_features), b: (out_features, 1).  Returns (B, 1)."""
    B, S = x.shape
    w1, b1, w2, b2, w3, b3 = (params[k] for k in ("w1", "b1", "w2", "b2", "w3", "b3"))

    TB, num_tiles, B_pad = _choose_tiling(B, tb_max)
    if B_pad != B:
        # Only the alignment remainder (or rare non-divisible batches) hits this copy.
        x = jnp.pad(x, ((0, B_pad - B), (0, 0)))

    # Constant index maps -> weight/bias tiles DMA'd once and kept VMEM-resident.
    const = lambda a: pl.BlockSpec(a.shape, lambda i: (0, 0))

    out = pl.pallas_call(
        critic_kernel,
        out_shape=jax.ShapeDtypeStruct((1, B_pad), jnp.float32),
        grid=(num_tiles,),
        in_specs=[
            pl.BlockSpec((TB, S), lambda i: (i, 0)),   # x: tiled over batch
            const(w1), const(b1), const(w2), const(b2), const(w3), const(b3),
        ],
        out_specs=pl.BlockSpec((1, TB), lambda i: (0, i)),   # lane-dense output slab
        compiler_params=pltpu.CompilerParams(
            dimension_semantics=("parallel",)),   # megacore / v7x dual-TC sharding
    )(x, w1, b1, w2, b2, w3, b3)

    return out[0, :B][:, None]   # back to (B, 1)


def init_params(num_state, key):
    """nn.Linear-style U(-1/sqrt(fan_in), 1/sqrt(fan_in)) in PyTorch orientation."""
    ks = jax.random.split(key, 6)

    def linear(kw, kb, fan_in, fan_out):
        bound = 1.0 / jnp.sqrt(fan_in)
        w = jax.random.uniform(kw, (fan_out, fan_in), jnp.float32, -bound, bound)
        b = jax.random.uniform(kb, (fan_out, 1), jnp.float32, -bound, bound)
        return w, b

    w1, b1 = linear(ks[0], ks[1], num_state, 64)
    w2, b2 = linear(ks[2], ks[3], 64, 8)
    w3, b3 = linear(ks[4], ks[5], 8, 1)
    return dict(w1=w1, b1=b1, w2=w2, b2=b2, w3=w3, b3=b3)


def critic_reference(x, p):
    def lrelu(v):
        return jnp.where(v > 0, v, NEG_SLOPE * v)
    h1 = lrelu(x @ p["w1"].T + p["b1"].T)
    h2 = lrelu(h1 @ p["w2"].T + p["b2"].T)
    return h2 @ p["w3"].T + p["b3"].T


if __name__ == "__main__":
    key = jax.random.PRNGKey(0)
    k_x, k_p = jax.random.split(key)

    num_state = 32
    params = init_params(num_state, k_p)

    # Small deterministic tests covering: single tile + remainder chunk (B=8),
    # multiple tiles with non-divisible batch (B=300), and the fori_loop chunk
    # path with two balanced tiles (B=512).
    for B in (8, 300, 512):
        x = jax.random.normal(jax.random.fold_in(k_x, B), (B, num_state), jnp.float32)
        value = critic_forward(x, params)
        value = jax.block_until_ready(value)

        ref = critic_reference(x, params)
        assert value.shape == (B, 1), (value.shape, B)
        err = float(jnp.max(jnp.abs(value - ref)))
        assert jnp.allclose(value, ref, atol=1e-4, rtol=1e-4), f"B={B} max abs err {err}"

    print("KERNEL_OK")
</pallas_src>

<mosaic_0001>
module attributes {stable_mosaic.version = 11 : i64} {
  func.func @critic_kernel(%arg0: i32, %arg1: memref<128x32xf32, #tpu.memory_space<vmem>>, %arg2: memref<64x32xf32, #tpu.memory_space<vmem>>, %arg3: memref<64x1xf32, #tpu.memory_space<vmem>>, %arg4: memref<8x64xf32, #tpu.memory_space<vmem>>, %arg5: memref<8x1xf32, #tpu.memory_space<vmem>>, %arg6: memref<1x8xf32, #tpu.memory_space<vmem>>, %arg7: memref<1x1xf32, #tpu.memory_space<vmem>>, %arg8: memref<1x128xf32, #tpu.memory_space<vmem>>) attributes {dimension_semantics = [#tpu.dimension_semantics<parallel>], iteration_bounds = array<i64: 1>, scalar_prefetch = 0 : i64, scratch_operands = 0 : i64, tpu.core_type = #tpu.core_type<tc>, window_params = [{transform_indices = @transform_0, window_bounds = array<i64: 128, 32>}, {pipeline_mode = #tpu.pipeline_mode<synchronous>, transform_indices = @transform_1, window_bounds = array<i64: 64, 32>}, {pipeline_mode = #tpu.pipeline_mode<synchronous>, transform_indices = @transform_2, window_bounds = array<i64: 64, 1>}, {pipeline_mode = #tpu.pipeline_mode<synchronous>, transform_indices = @transform_3, window_bounds = array<i64: 8, 64>}, {pipeline_mode = #tpu.pipeline_mode<synchronous>, transform_indices = @transform_4, window_bounds = array<i64: 8, 1>}, {pipeline_mode = #tpu.pipeline_mode<synchronous>, transform_indices = @transform_5, window_bounds = array<i64: 1, 8>}, {pipeline_mode = #tpu.pipeline_mode<synchronous>, transform_indices = @transform_6, window_bounds = array<i64: 1, 1>}, {transform_indices = @transform_7, window_bounds = array<i64: 1, 128>}]} {
    %c0 = arith.constant 0 : index
    %c0_0 = arith.constant 0 : index
    %0 = vector.load %arg2[%c0, %c0_0] : memref<64x32xf32, #tpu.memory_space<vmem>>, vector<64x32xf32>
    %c0_1 = arith.constant 0 : index
    %c0_2 = arith.constant 0 : index
    %1 = vector.load %arg3[%c0_1, %c0_2] : memref<64x1xf32, #tpu.memory_space<vmem>>, vector<64x1xf32>
    %c0_3 = arith.constant 0 : index
    %c0_4 = arith.constant 0 : index
    %2 = vector.load %arg4[%c0_3, %c0_4] : memref<8x64xf32, #tpu.memory_space<vmem>>, vector<8x64xf32>
    %c0_5 = arith.constant 0 : index
    %c0_6 = arith.constant 0 : index
    %3 = vector.load %arg5[%c0_5, %c0_6] : memref<8x1xf32, #tpu.memory_space<vmem>>, vector<8x1xf32>
    %c0_7 = arith.constant 0 : index
    %c0_8 = arith.constant 0 : index
    %4 = vector.load %arg6[%c0_7, %c0_8] : memref<1x8xf32, #tpu.memory_space<vmem>>, vector<1x8xf32>
    %c0_9 = arith.constant 0 : index
    %c0_10 = arith.constant 0 : index
    %5 = vector.load %arg7[%c0_9, %c0_10] : memref<1x1xf32, #tpu.memory_space<vmem>>, vector<1x1xf32>
    %c0_11 = arith.constant 0 : index
    %c0_12 = arith.constant 0 : index
    %6 = vector.load %arg1[%c0_11, %c0_12] : memref<128x32xf32, #tpu.memory_space<vmem>>, vector<128x32xf32>
    %cst = arith.constant dense<0.000000e+00> : vector<64x128xf32>
    %7 = tpu.matmul %0, %6, %cst {dimension_numbers = #tpu.dot_dimension_numbers<[1], [1], [0], [0], [0, 0, 1, 0], [], []>} : vector<64x32xf32>, vector<128x32xf32>, vector<64x128xf32> -> vector<64x128xf32>
    %8 = vector.broadcast %1 : vector<64x1xf32> to vector<64x128xf32>
    %9 = arith.addf %7, %8 : vector<64x128xf32>
    %cst_13 = arith.constant 0.00999999977 : f32
    %10 = vector.broadcast %cst_13 : f32 to vector<64x128xf32>
    %11 = arith.mulf %10, %9 : vector<64x128xf32>
    %12 = arith.maximumf %9, %11 : vector<64x128xf32>
    %cst_14 = arith.constant dense<0.000000e+00> : vector<8x128xf32>
    %13 = tpu.matmul %2, %12, %cst_14 {dimension_numbers = #tpu.dot_dimension_numbers<[1], [0], [0], [1], [0, 0, 1, 1], [], []>} : vector<8x64xf32>, vector<64x128xf32>, vector<8x128xf32> -> vector<8x128xf32>
    %14 = vector.broadcast %3 : vector<8x1xf32> to vector<8x128xf32>
    %15 = arith.addf %13, %14 : vector<8x128xf32>
    %cst_15 = arith.constant 0.00999999977 : f32
    %16 = vector.broadcast %cst_15 : f32 to vector<8x128xf32>
    %17 = arith.mulf %16, %15 : vector<8x128xf32>
    %18 = arith.maximumf %15, %17 : vector<8x128xf32>
    %cst_16 = arith.constant dense<0.000000e+00> : vector<1x128xf32>
    %19 = tpu.matmul %4, %18, %cst_16 {dimension_numbers = #tpu.dot_dimension_numbers<[1], [0], [0], [1], [0, 0, 1, 1], [], []>} : vector<1x8xf32>, vector<8x128xf32>, vector<1x128xf32> -> vector<1x128xf32>
    %20 = vector.broadcast %5 : vector<1x1xf32> to vector<1x128xf32>
    %21 = arith.addf %19, %20 : vector<1x128xf32>
    %c0_17 = arith.constant 0 : index
    %c0_18 = arith.constant 0 : index
    %22 = vector.load %arg8[%c0_17, %c0_18] : memref<1x128xf32, #tpu.memory_space<vmem>>, vector<1x128xf32>
    tpu.vector_store %arg8[%c0_17, %c0_18], %21 {strides = array<i32>} : memref<1x128xf32, #tpu.memory_space<vmem>>, vector<1x128xf32>,
    return
  }
  func.func @transform_0(%arg0: i32) -> (i32, i32) {
    %c0_i32 = arith.constant 0 : i32
    %c0_i32_0 = arith.constant 0 : i32
    return %arg0, %c0_i32 : i32, i32
  }
  func.func @transform_1(%arg0: i32) -> (i32, i32) {
    %c0_i32 = arith.constant 0 : i32
    %c0_i32_0 = arith.constant 0 : i32
    %c0_i32_1 = arith.constant 0 : i32
    return %c0_i32, %c0_i32_0 : i32, i32
  }
  func.func @transform_2(%arg0: i32) -> (i32, i32) {
    %c0_i32 = arith.constant 0 : i32
    %c0_i32_0 = arith.constant 0 : i32
    %c0_i32_1 = arith.constant 0 : i32
    return %c0_i32, %c0_i32_0 : i32, i32
  }
  func.func @transform_3(%arg0: i32) -> (i32, i32) {
    %c0_i32 = arith.constant 0 : i32
    %c0_i32_0 = arith.constant 0 : i32
    %c0_i32_1 = arith.constant 0 : i32
    return %c0_i32, %c0_i32_0 : i32, i32
  }
  func.func @transform_4(%arg0: i32) -> (i32, i32) {
    %c0_i32 = arith.constant 0 : i32
    %c0_i32_0 = arith.constant 0 : i32
    %c0_i32_1 = arith.constant 0 : i32
    return %c0_i32, %c0_i32_0 : i32, i32
  }
  func.func @transform_5(%arg0: i32) -> (i32, i32) {
    %c0_i32 = arith.constant 0 : i32
    %c0_i32_0 = arith.constant 0 : i32
    %c0_i32_1 = arith.constant 0 : i32
    return %c0_i32, %c0_i32_0 : i32, i32
  }
  func.func @transform_6(%arg0: i32) -> (i32, i32) {
    %c0_i32 = arith.constant 0 : i32
    %c0_i32_0 = arith.constant 0 : i32
    %c0_i32_1 = arith.constant 0 : i32
    return %c0_i32, %c0_i32_0 : i32, i32
  }
  func.func @transform_7(%arg0: i32) -> (i32, i32) {
    %c0_i32 = arith.constant 0 : i32
    %c0_i32_0 = arith.constant 0 : i32
    return %c0_i32, %arg0 : i32, i32
  }
}

</mosaic_0001>

<bundles_post_ra>
// kernel: tpu_custom_call.1
= control target key start
LH: loop header
LB: loop body
LE: loop exit
PB: predicated region body
PF: predicated region fallthrough
CT: control target
= control target key end

     0   :  { %s843_s0 = inlined_call_operand.vmem [shape: f32[128,32], index: 0, kind: input, shape index: {}]   ;;  %s844_s1 = inlined_call_operand.vmem [shape: f32[64,32], index: 1, kind: input, shape index: {}]   ;;  %s845_s2 = inlined_call_operand.vmem [shape: f32[64,1], index: 2, kind: input, shape index: {}]   ;;  %s846_s3 = inlined_call_operand.vmem [shape: f32[8,64], index: 3, kind: input, shape index: {}]   ;;  %s847_s4 = inlined_call_operand.vmem [shape: f32[8,1], index: 4, kind: input, shape index: {}]   ;;  %s848_s5 = inlined_call_operand.vmem [shape: f32[1,8], index: 5, kind: input, shape index: {}]   ;;  %s849_s6 = inlined_call_operand.<no memory space> [shape: f32[1,1], index: 6, kind: input, shape index: {}]   ;;  %s850_s7 = inlined_call_operand.hbm [shape: f32[1,128], index: 7, kind: output, shape index: {}]  }
   0x1   :  { %v12_v0 = vstv %s849_s6 }
   0x2   :  { %13 = vst [vmem:[#allocation2] sm:$0x1] %v12_v0 }
   0x3   :  { %v64_v1 = vld [vmem:[%s843_s0 + $0x78] sm:$0xff]  ;;  %vm105_vm0 = vcmask 261120   ;;  %v63_v2 = vld [vmem:[%s843_s0 + $0x70] sm:$0xff]  ;;  %v635_v3 = vmov 0   ;;  %v62_v4 = vld [vmem:[%s843_s0 + $0x68] sm:$0xff] }
   0x4   :  { %539 = vmatprep.subr.msk.mxu0 %vm105_vm0, %v64_v1  ;;  %611 = vset.pattern.permute.xlu0 %v635_v3  ;;  %v29_v5 = vld [vmem:[%s844_s1] sm:$0xff]  ;;  %v44_v7 = vld [vmem:[%s845_s2 + $0x38] sm:$0xff]  ;;  %v42_v8 = vld [vmem:[%s845_s2 + $0x28] sm:$0xff] }
   0x5   :  { %540 = vmatpush3.xpose.msk.msra.mxu0 %vm105_vm0, %v64_v1  ;;  %612 = vset.pattern.permute.xlu1 %v635_v3  ;;  %v61_v6 = vld [vmem:[%s843_s0 + $0x60] sm:$0xff]  ;;  %v43_v9 = vld [vmem:[%s845_s2 + $0x30] sm:$0xff] }
   0x6   :  { %541 = vmatprep.subr.msk.mxu0 %vm105_vm0, %v63_v2  ;;  %571 = vmatprep.mubr.msk.f32.mxu0 %vm105_vm0, %v29_v5  ;;  %v41_v10 = vld [vmem:[%s845_s2 + $0x20] sm:$0xff] }
   0x7   :  { %102 = vperm.xlu0 %611, %v44_v7   ;;  %92 = vperm.xlu1 %612, %v42_v8  }
   0x9   :  { %542 = vmatpush3.xpose.msk.msra.mxu0 %vm105_vm0, %v63_v2 }
   0xa   :  { %543 = vmatprep.subr.msk.mxu0 %vm105_vm0, %v62_v4 }
   0xd   :  { %544 = vmatpush3.xpose.msk.msra.mxu0 %vm105_vm0, %v62_v4 }
   0xe   :  { %545 = vmatprep.subr.msk.mxu0 %vm105_vm0, %v61_v6 }
   0xf   :  { %14 = vsyncpa [#allocation4], 0  ;;  %v60_v11 = vld [vmem:[%s843_s0 + $0x58] sm:$0xff]  ;;  %97 = vperm.xlu0 %611, %v43_v9   ;;  %87 = vperm.xlu1 %612, %v41_v10   ;;  %v39_v13 = vld [vmem:[%s845_s2 + $0x10] sm:$0xff]  ;;  %v636_v36 = vmov 0.0   ;;  %vm637_vm1 = vmmov 0  }
  0x10   :  { %v40_v12 = vld [vmem:[%s845_s2 + $0x18] sm:$0xff]  ;;  %v59_v14 = vld [vmem:[%s843_s0 + $0x50] sm:$0xff]  ;;  %v38_v15 = vld [vmem:[%s845_s2 + $0x8] sm:$0xff]  ;;  %583 = vmatprep.subr.mxu1 %v636_v36  ;;  %599 = vmatprep.mubr.msk.f32.mxu1 %vm637_vm1, %v636_v36  ;;  %vm304_vm2 = vcmask 523264   ;;  %vm389_vm3 = vcmask 64512  }
  0x11   :  { %546 = vmatpush3.xpose.msk.msra.mxu0 %vm105_vm0, %v61_v6  ;;  %v37_v16 = vld [vmem:[%s845_s2] sm:$0xff]  ;;  %v58_v17 = vld [vmem:[%s843_s0 + $0x48] sm:$0xff]  ;;  %v56_v21 = vld [vmem:[%s843_s0 + $0x38] sm:$0xff] }
  0x12   :  { %547 = vmatprep.subr.msk.mxu0 %vm105_vm0, %v60_v11  ;;  %v46_v18 = vld [vmem:[%s847_s4] sm:$0xff]  ;;  %v55_v22 = vld [vmem:[%s843_s0 + $0x30] sm:$0xff]  ;;  %v54_v23 = vld [vmem:[%s843_s0 + $0x28] sm:$0xff] }
  0x13   :  { %82 = vperm.xlu0 %611, %v40_v12   ;;  %77 = vperm.xlu1 %612, %v39_v13   ;;  %v48_v19 = vld [vmem:[#allocation2] sm:$0x1]  ;;  %v52_v25 = vld [vmem:[%s843_s0 + $0x18] sm:$0xff]  ;;  %v51_v26 = vld [vmem:[%s843_s0 + $0x10] sm:$0xff] }
  0x14   :  { %v57_v20 = vld [vmem:[%s843_s0 + $0x40] sm:$0xff]  ;;  %v50_v27 = vld [vmem:[%s843_s0 + $0x8] sm:$0xff]  ;;  %v31_v30 = vld [vmem:[%s844_s1 + $0x10] sm:$0xff] }
  0x15   :  { %548 = vmatpush3.xpose.msk.msra.mxu0 %vm105_vm0, %v60_v11  ;;  %v53_v24 = vld [vmem:[%s843_s0 + $0x20] sm:$0xff]  ;;  %v30_v29 = vld [vmem:[%s844_s1 + $0x8] sm:$0xff]  ;;  %v32_v31 = vld [vmem:[%s844_s1 + $0x18] sm:$0xff] }
  0x16   :  { %549 = vmatprep.subr.msk.mxu0 %vm105_vm0, %v59_v14  ;;  %v49_v28 = vld [vmem:[%s843_s0] sm:$0xff]  ;;  %v34_v33 = vld [vmem:[%s844_s1 + $0x28] sm:$0xff]  ;;  %v35_v34 = vld [vmem:[%s844_s1 + $0x30] sm:$0xff] }
  0x17   :  { %72 = vperm.xlu0 %611, %v38_v15   ;;  %67 = vperm.xlu1 %612, %v37_v16   ;;  %v33_v32 = vld [vmem:[%s844_s1 + $0x20] sm:$0xff]  ;;  %v36_v35 = vld [vmem:[%s844_s1 + $0x38] sm:$0xff] }
  0x18   :  { %v45_v13 = vld [vmem:[%s846_s3] sm:$0xff]  ;;  %s638_s3 = smov [#allocation3]  }
  0x19   :  { %550 = vmatpush3.xpose.msk.msra.mxu0 %vm105_vm0, %v59_v14  ;;  %s470_s18 = sshll.u32 %s638_s3, 4  ;;  %s471_s18 = int_to_ptr.vmem [resolvable:$true] %s470_s18 }
  0x1a   :  { %551 = vmatprep.subr.msk.mxu0 %vm105_vm0, %v58_v17  ;;  %s613_s19 = scalar_lea.vmem %s471_s18, 16  ;;  %s617_s20 = scalar_lea.vmem %s471_s18, 32 }
  0x1b   :  { %301 = vperm.xlu0 %611, %v46_v18   ;;  %382 = vperm.xlu1 %612, %v48_v19   ;;  %p614_p0 = scmp.ne.s32.totalorder %s471_s18, %s613_s19  ;;  %p618_p1 = scmp.lt.s32.totalorder %s471_s18, %s471_s18 }
  0x1c   :  { %p619_p2 = scmp.lt.s32.totalorder %s617_s20, %s613_s19 }
  0x1d   :  { %552 = vmatpush3.xpose.msk.msra.mxu0 %vm105_vm0, %v58_v17 }
  0x1e   :  { %553 = vmatprep.subr.msk.mxu0 %vm105_vm0, %v57_v20  ;;  %p620_p3 = por %p619_p2, %p618_p1 }
  0x20   :  { %p621_p4 = pnand %p620_p3, %p614_p0 }
  0x21   :  { %554 = vmatpush3.xpose.msk.msra.mxu0 %vm105_vm0, %v57_v20  ;;  %v47_v20 = vld [vmem:[%s848_s5] sm:$0x1] }
  0x22   :  { %555 = vmatprep.subr.msk.mxu0 %vm105_vm0, %v56_v21 }
  0x25   :  { %556 = vmatpush3.xpose.msk.msra.mxu0 %vm105_vm0, %v56_v21  ;;  %v385_v21 = vlaneseq }
  0x26   :  { %557 = vmatprep.subr.msk.mxu0 %vm105_vm0, %v55_v22 }
  0x29   :  { %558 = vmatpush3.xpose.msk.msra.mxu0 %vm105_vm0, %v55_v22  ;;  %v386_v22 = vshrl.u32 %v385_v21, 7 }
  0x2a   :  { %559 = vmatprep.subr.msk.mxu0 %vm105_vm0, %v54_v23 }
  0x2d   :  { %560 = vmatpush3.xpose.msk.msra.mxu0 %vm105_vm0, %v54_v23  ;;  %v387_v23 = vsub.s32 0, %v386_v22 }
  0x2e   :  { %561 = vmatprep.subr.msk.mxu0 %vm105_vm0, %v53_v24 }
  0x31   :  { %562 = vmatpush3.xpose.msk.msra.mxu0 %vm105_vm0, %v53_v24 }
  0x32   :  { %563 = vmatprep.subr.msk.mxu0 %vm105_vm0, %v52_v25 }
  0x35   :  { %564 = vmatpush3.xpose.msk.msra.mxu0 %vm105_vm0, %v52_v25 }
  0x36   :  { %565 = vmatprep.subr.msk.mxu0 %vm105_vm0, %v51_v26 }
  0x39   :  { %566 = vmatpush3.xpose.msk.msra.mxu0 %vm105_vm0, %v51_v26 }
  0x3a   :  { %567 = vmatprep.subr.msk.mxu0 %vm105_vm0, %v50_v27 }
  0x3d   :  { %568 = vmatpush3.xpose.msk.msra.mxu0 %vm105_vm0, %v50_v27 }
  0x3e   :  { %569 = vmatprep.subr.msk.mxu0 %vm105_vm0, %v49_v28 }
  0x41   :  { %570 = vmatpush3.xpose.msk.msra.mxu0 %vm105_vm0, %v49_v28 }
  0x44   :  { %572 = vmatmul.mubr.msk.f32.vlgmr.msra.gmra.mxu0 %vm105_vm0, %v30_v29 }
  0x45   :  { %574 = vmatprep.mubr.msk.f32.mxu0 %vm105_vm0, %v31_v30 }
  0x48   :  { %575 = vmatmul.mubr.msk.f32.gmra.mxu0 %vm105_vm0, %v32_v31 }
  0x49   :  { %577 = vmatprep.mubr.msk.f32.mxu0 %vm105_vm0, %v33_v32 }
  0x4c   :  { %578 = vmatmul.mubr.msk.f32.gmra.mxu0 %vm105_vm0, %v34_v33 }
  0x4d   :  { %580 = vmatprep.mubr.msk.f32.mxu0 %vm105_vm0, %v35_v34 }
  0x50   :  { %581 = vmatmul.mubr.msk.f32.gmra.mxu0 %vm105_vm0, %v36_v35 }
  0x82   :  { %v103_v37 = vpop.permute.xlu0 %102  ;;  %v93_v39 = vpop.permute.xlu1 %92 }
  0x8a   :  { %v98_v42 = vpop.permute.xlu0 %97  ;;  %v88_v44 = vpop.permute.xlu1 %87 }
  0x8e   :  { %v83_v47 = vpop.permute.xlu0 %82  ;;  %v78_v51 = vpop.permute.xlu1 %77 }
  0x92   :  { %v73_v60 = vpop.permute.xlu0 %72  ;;  %v68_v0 = vpop.permute.xlu1 %67 }
  0x96   :  { %v302_v14 = vpop.permute.xlu0 %301  ;;  %v383_v24 = vpop.permute.xlu1 %382 }
  0x97   :  { %v388_v25 = vrot.slane %v383_v24, %v387_v23 }
 0x104   :  { %v573_v38 = vpop.f32.mrf.mxu0 }
 0x105   :  { %v250_v1 = vadd.f32 %v573_v38, %v73_v60 }
 0x106   :  { %v244_v40 = vpop.f32.mrf.mxu0 }
 0x107   :  { %v245_v4 = vadd.f32 %v244_v40, %v68_v0  ;;  %v284_v7 = vmul.f32 0.01, %v250_v1 }
 0x108   :  { %v576_v41 = vpop.f32.mrf.mxu0 }
 0x109   :  { %v260_v56 = vadd.f32 %v576_v41, %v83_v47  ;;  %v283_v9 = vmul.f32 0.01, %v245_v4  ;;  %v292_v11 = vmax.f32 %v250_v1, %v284_v7 }
 0x10a   :  { %v254_v43 = vpop.f32.mrf.mxu0 }
 0x10b   :  { %v255_v61 = vadd.f32 %v254_v43, %v78_v51  ;;  %v286_v2 = vmul.f32 0.01, %v260_v56  ;;  %v291_v12 = vmax.f32 %v245_v4, %v283_v9 }
 0x10c   :  { %v579_v45 = vpop.f32.mrf.mxu0 }
 0x10d   :  { %v270_v49 = vadd.f32 %v579_v45, %v93_v39  ;;  %v285_v5 = vmul.f32 0.01, %v255_v61  ;;  %v294_v8 = vmax.f32 %v260_v56, %v286_v2 }
 0x10e   :  { %v264_v46 = vpop.f32.mrf.mxu0 }
 0x10f   :  { %v265_v53 = vadd.f32 %v264_v46, %v88_v44  ;;  %v288_v57 = vmul.f32 0.01, %v270_v49  ;;  %v293_v10 = vmax.f32 %v255_v61, %v285_v5 }
 0x110   :  { %v582_v48 = vpop.f32.mrf.mxu0 }
 0x111   :  { %v280_v50 = vadd.f32 %v582_v48, %v103_v37  ;;  %v287_v62 = vmul.f32 0.01, %v265_v53  ;;  %v296_v3 = vmax.f32 %v270_v49, %v288_v57 }
 0x112   :  { %v274_v52 = vpop.f32.mrf.mxu0 }
 0x113   :  { %v290_v54 = vmul.f32 0.01, %v280_v50  ;;  %v275_v55 = vadd.f32 %v274_v52, %v98_v42  ;;  %v295_v6 = vmax.f32 %v265_v53, %v287_v62 }
 0x115   :  { %v289_v58 = vmul.f32 0.01, %v275_v55  ;;  %v298_v59 = vmax.f32 %v280_v50, %v290_v54 }
 0x117   :  { %v297_v63 = vmax.f32 %v275_v55, %v289_v58  ;;  %584 = vmatpush3.msra.mxu1 %v298_v59 }
 0x118   :  { %585 = vmatprep.subr.mxu1 %v636_v36 }
 0x119   :  { %586 = vmatpush3.msra.mxu1 %v297_v63 }
 0x11a   :  { %587 = vmatprep.subr.mxu1 %v636_v36 }
 0x11b   :  { %588 = vmatpush3.msra.mxu1 %v296_v3 }
 0x11c   :  { %589 = vmatprep.subr.mxu1 %v636_v36 }
 0x11d   :  { %590 = vmatpush3.msra.mxu1 %v295_v6 }
 0x11e   :  { %591 = vmatprep.subr.mxu1 %v636_v36 }
 0x11f   :  { %592 = vmatpush3.msra.mxu1 %v294_v8 }
 0x120   :  { %593 = vmatprep.subr.mxu1 %v636_v36 }
 0x121   :  { %594 = vmatpush3.msra.mxu1 %v293_v10 }
 0x122   :  { %595 = vmatprep.subr.mxu1 %v636_v36 }
 0x123   :  { %596 = vmatpush3.msra.mxu1 %v292_v11 }
 0x124   :  { %597 = vmatprep.subr.mxu1 %v636_v36 }
 0x125   :  { %598 = vmatpush3.msra.mxu1 %v291_v12 }
 0x126   :  { %600 = vmatmul.mubr.msk.f32.vlgmr.msra.gmra.mxu1 %vm304_vm2, %v45_v13  ;;  %602 = vmatprep.subr.mxu1 %v636_v36 }
 0x127   :  { %604 = vmatprep.mubr.msk.f32.mxu1 %vm637_vm1, %v636_v36 }
 0x1e6   :  { %v374_v15 = vpop.f32.mrf.mxu1 }
 0x1e7   :  { %v375_v16 = vadd.f32 %v374_v15, %v302_v14 }
 0x1e8   :  { %v601_v17 = vpop.f32.mrf.mxu1 }
 0x1e9   :  { %v378_v18 = vmul.f32 0.01, %v375_v16 }
 0x1eb   :  { %v379_v19 = vmax.f32 %v375_v16, %v378_v18 }
 0x1ed   :  { %603 = vmatpush3.msra.mxu1 %v379_v19 }
 0x1ee   :  { %605 = vmatmul.mubr.msk.f32.vlgmr.msra.gmra.mxu1 %vm389_vm3, %v47_v20 }
 0x2ae   :  { %v459_v26 = vpop.f32.mrf.mxu1 }
 0x2af   :  { %v460_v27 = vadd.f32 %v459_v26, %v388_v25 }
 0x2b0   :  { %v606_v28 = vpop.f32.mrf.mxu1 }
 0x2b1   :  { %463 = vst [vmem:[#allocation3] sm:$0x1] %v460_v27 }
 0x2b2   :  { %624 = shalt.err (!%p621_p4)
}
 0x2b3   :  { %473 = dma.vmem_to_hbm [thread:$0]  %s471_s18, 16, %s850_s7, [#allocation4]  }
 0x2b4   :  { %633 = dma.done.wait [#allocation4], 16  }
 0x2b5   :  { %634 = vsyncadd [#allocation4], 4294967280 }
 0x2b6   :  { %477 = vsyncpa [#allocation4], 1 }

</bundles_post_ra>
